<compile_context>
chip_gen: v7x
topology: tpu7x:2x2x1
jax: 0.10.0
libtpu: 0.0.40
codegen_flags: <defaults>
</compile_context>

<pallas_src>
import math
import sys
from functools import partial

import jax
import jax.numpy as jnp
from jax.experimental import pallas as pl
from jax.experimental.pallas import tpu as pltpu


# ----------------------------- in-kernel helpers -----------------------------

def _layernorm(x, gamma, beta, eps=1e-5):
    mean = jnp.mean(x, axis=-1, keepdims=True)
    var = jnp.mean((x - mean) ** 2, axis=-1, keepdims=True)
    return (x - mean) * jax.lax.rsqrt(var + eps) * gamma + beta


def _gelu_exact(x):
    # nn.GELU() default = exact erf-based GELU.
    # TODO(synk): evaluate in bf16 (bf16 VALU) or tanh-approx (EUP) if VALU becomes the
    #             binding slot of the fused FFN kernel on v6e/v7x.
    return 0.5 * x * (1.0 + jax.lax.erf(x * (1.0 / math.sqrt(2.0))))


# ----------------------------- runtime / tiling helpers -----------------------------

_SINGLE_BUFFER_OK = None


def _probe_single_buffer():
    """Check once whether pipeline_mode=pl.Buffered(1) is supported on this runtime."""
    try:
        def k(x_ref, o_ref):
            o_ref[...] = x_ref[...] + 1.0

        spec = pl.BlockSpec((8, 128), lambda i: (0, 0), pipeline_mode=pl.Buffered(1))
        f = pl.pallas_call(
            k,
            out_shape=jax.ShapeDtypeStruct((16, 128), jnp.float32),
            grid=(2,),
            in_specs=[spec],
            out_specs=pl.BlockSpec((8, 128), lambda i: (i, 0)),
        )
        jax.block_until_ready(f(jnp.zeros((8, 128), jnp.float32)))
        return True
    except Exception as e:  # noqa: BLE001 - fallback must never kill the forward pass
        print(f"[pallas-wikitransformer] warning: Buffered(1) unsupported, "
              f"falling back to double-buffered weights ({type(e).__name__})",
              file=sys.stderr)
        return False


def _single_buffer_ok():
    global _SINGLE_BUFFER_OK
    if _SINGLE_BUFFER_OK is None:
        _SINGLE_BUFFER_OK = _probe_single_buffer()
    return _SINGLE_BUFFER_OK


def _weight_buffer_factor():
    # grid-invariant weights: 1x if single-buffered, 2x if we had to fall back.
    return 1 if _single_buffer_ok() else 2


def _const_spec(shape):
    """BlockSpec for a grid-invariant (weight) input: same block at every grid step."""
    nd = len(shape)
    index_map = lambda *_: (0,) * nd
    if _single_buffer_ok():
        return pl.BlockSpec(shape, index_map, pipeline_mode=pl.Buffered(1))
    return pl.BlockSpec(shape, index_map)


def _pick_tile(n, candidates):
    for t in candidates:
        if t <= n and n % t == 0:
            return t
    return n


_ROW_TILES = (256, 128, 64, 32, 16, 8)              # 256 rows fills a 256-wide MXU
_VOCAB_TILES = (4096, 2048, 1024, 512, 256, 128)    # large vocab tiles amortize step overhead


def _nbytes(shape, dtype):
    n = 1
    for d in shape:
        n *= int(d)
    return n * jnp.dtype(dtype).itemsize


_VMEM_CAP = None


def _vmem_cap_bytes():
    global _VMEM_CAP
    if _VMEM_CAP is None:
        cap = 64 << 20                               # conservative default (v7x-sized)
        try:
            info = pltpu.get_tpu_info()
            c = int(getattr(info, "vmem_capacity_bytes", 0))
            if c > 0:
                cap = c
        except Exception:
            pass
        _VMEM_CAP = cap
    return _VMEM_CAP


def _vmem_limit(streamed_bytes, resident_bytes=0):
    """streamed blocks are double-buffered; resident weights/temps counted as given."""
    need = 2 * int(streamed_bytes) + int(resident_bytes) + (2 << 20)
    cap = (_vmem_cap_bytes() * 3) // 4               # ~96 MiB on 128-MiB parts, ~48 MiB on v7x
    return int(min(max(need, 4 << 20), cap))


# ----------------------------- kernel 1: fused QKV projection (row-tiled) -----------------------------

def qkv_proj_kernel(x_ref, w_ref, b_ref, o_ref):
    acc = jnp.dot(x_ref[...], w_ref[...], preferred_element_type=jnp.float32)
    o_ref[...] = (acc + b_ref[...]).astype(o_ref.dtype)


def run_qkv_proj(x_bf16, wqkv_bf16, bqkv):
    R, D = x_bf16.shape
    threeD = wqkv_bf16.shape[1]
    tr = _pick_tile(R, _ROW_TILES)
    streamed = (_nbytes((tr, D), jnp.bfloat16) + _nbytes((tr, threeD), jnp.bfloat16))
    resident = (_nbytes((D, threeD), jnp.bfloat16)
                + _nbytes((1, threeD), jnp.float32)) * _weight_buffer_factor()
    return pl.pallas_call(
        qkv_proj_kernel,
        out_shape=jax.ShapeDtypeStruct((R, threeD), jnp.bfloat16),
        grid=(R // tr,),
        in_specs=[
            pl.BlockSpec((tr, D), lambda i: (i, 0)),
            _const_spec((D, threeD)),
            _const_spec((1, threeD)),
        ],
        out_specs=pl.BlockSpec((tr, threeD), lambda i: (i, 0)),
        compiler_params=pltpu.CompilerParams(
            dimension_semantics=("parallel",),
            vmem_limit_bytes=_vmem_limit(streamed, resident)),
    )(x_bf16, wqkv_bf16, bqkv)


# ----------------------------- kernel 2: attention (grid over batch, all heads per step) -----------------------------

def attention_kernel(qkv_ref, o_ref, *, n_heads, d_k, scale):
    S = qkv_ref.shape[0]
    D = n_heads * d_k
    qkv = qkv_ref[...]                                         # (S, 3D) bf16

    # causal mask built in-kernel (no (S,S) f32 bias input, no extra DMA / resident VMEM)
    row = jax.lax.broadcasted_iota(jnp.int32, (S, S), 0)
    col = jax.lax.broadcasted_iota(jnp.int32, (S, S), 1)
    causal = col <= row

    ctx_parts = []
    for h in range(n_heads):                                   # static unroll: one grid step per batch element
        q = qkv[:, h * d_k:(h + 1) * d_k]                      # (S, dk)
        k = qkv[:, D + h * d_k:D + (h + 1) * d_k]
        v = qkv[:, 2 * D + h * d_k:2 * D + (h + 1) * d_k]
        # contract last dims of q and k directly (no explicit transpose of K)
        s = jax.lax.dot_general(q, k, (((1,), (1,)), ((), ())),
                                preferred_element_type=jnp.float32) * scale
        s = jnp.where(causal, s, -1e9)
        m = jnp.max(s, axis=-1, keepdims=True)
        p = jnp.exp(s - m)
        denom = jnp.sum(p, axis=-1, keepdims=True)
        p = p * pl.reciprocal(denom, approx=True)              # EUP, off the VALU
        ctx_parts.append(jnp.dot(p.astype(jnp.bfloat16), v,
                                 preferred_element_type=jnp.float32))
    ctx = jnp.concatenate(ctx_parts, axis=1)                   # (S, D): single lane-dense store
    o_ref[...] = ctx.astype(o_ref.dtype)
    # TODO(synk): flash-style q-tiling with online softmax to bound the (S,S) score live set.


def run_attention(qkv2d, B, S, n_heads, d_k):
    D = n_heads * d_k
    streamed = (_nbytes((S, 3 * D), jnp.bfloat16) + _nbytes((S, D), jnp.bfloat16))
    temps = 3 * _nbytes((S, S), jnp.float32)                   # per-head score/softmax live set
    return pl.pallas_call(
        partial(attention_kernel, n_heads=n_heads, d_k=d_k, scale=1.0 / math.sqrt(d_k)),
        out_shape=jax.ShapeDtypeStruct((B * S, D), jnp.bfloat16),
        grid=(B,),
        in_specs=[pl.BlockSpec((S, 3 * D), lambda b: (b, 0))],
        out_specs=pl.BlockSpec((S, D), lambda b: (b, 0)),
        compiler_params=pltpu.CompilerParams(
            dimension_semantics=("parallel",),
            vmem_limit_bytes=_vmem_limit(streamed, temps)),
    )(qkv2d)


# ----------------------------- kernel 3: wo + LN1 + FFN + LN2 (row-tiled, dual output) -----------------------------

def post_attn_ffn_kernel(x_ref, ctx_ref,
                         wo_ref, bo_ref, g1_ref, be1_ref,
                         w1_ref, b1_ref, w2_ref, b2_ref,
                         g2_ref, be2_ref,
                         o_f32_ref, o_bf16_ref):
    x = x_ref[...]                                             # (TR, D) f32 residual stream
    attn = jnp.dot(ctx_ref[...], wo_ref[...],
                   preferred_element_type=jnp.float32) + bo_ref[...]
    x1 = _layernorm(x + attn, g1_ref[...], be1_ref[...])
    h = jnp.dot(x1.astype(jnp.bfloat16), w1_ref[...],
                preferred_element_type=jnp.float32) + b1_ref[...]
    h = _gelu_exact(h)
    y = jnp.dot(h.astype(jnp.bfloat16), w2_ref[...],
                preferred_element_type=jnp.float32) + b2_ref[...]
    x2 = _layernorm(x1 + y, g2_ref[...], be2_ref[...])
    o_f32_ref[...] = x2
    o_bf16_ref[...] = x2.astype(jnp.bfloat16)                  # feeds next layer's QKV projection


def run_post_attn_ffn(x2d, ctx2d, L):
    R, D = x2d.shape
    F = L["w1"].shape[1]
    tr = _pick_tile(R, _ROW_TILES)
    streamed = (_nbytes((tr, D), jnp.float32) + _nbytes((tr, D), jnp.bfloat16)   # x, ctx in
                + _nbytes((tr, D), jnp.float32) + _nbytes((tr, D), jnp.bfloat16))  # outs
    resident = ((_nbytes((D, D), jnp.bfloat16)
                 + _nbytes((D, F), jnp.bfloat16) + _nbytes((F, D), jnp.bfloat16)
                 + 6 * _nbytes((1, D), jnp.float32) + _nbytes((1, F), jnp.float32))
                * _weight_buffer_factor()
                + _nbytes((tr, F), jnp.float32)                # GELU intermediate live set
                + _nbytes((tr, D), jnp.float32))
    return pl.pallas_call(
        post_attn_ffn_kernel,
        out_shape=(jax.ShapeDtypeStruct((R, D), jnp.float32),
                   jax.ShapeDtypeStruct((R, D), jnp.bfloat16)),
        grid=(R // tr,),
        in_specs=[
            pl.BlockSpec((tr, D), lambda i: (i, 0)),           # residual stream (f32)
            pl.BlockSpec((tr, D), lambda i: (i, 0)),           # attention context (bf16)
            _const_spec((D, D)), _const_spec((1, D)),          # wo, bo
            _const_spec((1, D)), _const_spec((1, D)),          # ln1 gamma, beta
            _const_spec((D, F)), _const_spec((1, F)),          # w1, b1
            _const_spec((F, D)), _const_spec((1, D)),          # w2, b2
            _const_spec((1, D)), _const_spec((1, D)),          # ln2 gamma, beta
        ],
        out_specs=(pl.BlockSpec((tr, D), lambda i: (i, 0)),
                   pl.BlockSpec((tr, D), lambda i: (i, 0))),
        compiler_params=pltpu.CompilerParams(
            dimension_semantics=("parallel",),
            vmem_limit_bytes=_vmem_limit(streamed, resident)),
    )(x2d, ctx2d, L["wo"], L["bo"], L["g1"], L["be1"],
      L["w1"], L["b1"], L["w2"], L["b2"], L["g2"], L["be2"])


# ----------------------------- kernel 4: final LN + LM head (row x vocab tiled, LN cached) -----------------------------

def ln_head_kernel(x_ref, g_ref, b_ref, wh_ref, bh_ref, o_ref, xn_ref):
    @pl.when(pl.program_id(1) == 0)
    def _():
        # LayerNorm + bf16 cast computed once per row tile, reused across all vocab tiles
        xn_ref[...] = _layernorm(x_ref[...], g_ref[...], b_ref[...]).astype(jnp.bfloat16)
    o_ref[...] = (jnp.dot(xn_ref[...], wh_ref[...],
                          preferred_element_type=jnp.float32) + bh_ref[...])


def run_ln_head(x2d, g, b, wh_bf16, bh):
    R, D = x2d.shape
    V = wh_bf16.shape[1]
    tr = _pick_tile(R, _ROW_TILES)
    tv = _pick_tile(V, _VOCAB_TILES)
    streamed = (_nbytes((D, tv), jnp.bfloat16) + _nbytes((1, tv), jnp.float32)
                + _nbytes((tr, tv), jnp.float32))
    resident = (_nbytes((tr, D), jnp.float32) * 2               # x block (resident across vocab axis)
                + 2 * _nbytes((1, D), jnp.float32) * _weight_buffer_factor()
                + _nbytes((tr, D), jnp.bfloat16))               # LN scratch
    return pl.pallas_call(
        ln_head_kernel,
        out_shape=jax.ShapeDtypeStruct((R, V), jnp.float32),
        grid=(R // tr, V // tv),
        in_specs=[
            pl.BlockSpec((tr, D), lambda i, j: (i, 0)),        # resident across vocab tiles
            _const_spec((1, D)), _const_spec((1, D)),
            pl.BlockSpec((D, tv), lambda i, j: (0, j)),        # streamed vocab tiles
            pl.BlockSpec((1, tv), lambda i, j: (0, j)),
        ],
        out_specs=pl.BlockSpec((tr, tv), lambda i, j: (i, j)),
        scratch_shapes=[pltpu.VMEM((tr, D), jnp.bfloat16)],
        compiler_params=pltpu.CompilerParams(
            dimension_semantics=("parallel", "arbitrary"),      # rows megacore-sharded; vocab sequential
            vmem_limit_bytes=_vmem_limit(streamed, resident)),
    )(x2d, g, b, wh_bf16, bh)


# ----------------------------- parameters & glue -----------------------------

def make_positional_encoding(max_length, d_model):
    position = jnp.arange(max_length, dtype=jnp.float32)[:, None]
    div_term = jnp.exp(jnp.arange(0, d_model, 2, dtype=jnp.float32)
                       * (-math.log(10000.0) / d_model))
    pe = jnp.zeros((max_length, d_model), dtype=jnp.float32)
    pe = pe.at[:, 0::2].set(jnp.sin(position * div_term))
    pe = pe.at[:, 1::2].set(jnp.cos(position * div_term))
    return pe                                                  # (max_length, d_model)


def init_params(key, vocab, d_model, n_heads, d_ff, n_layers):
    """Float32 master parameters (used by the reference and to derive Pallas params)."""
    std = 0.02
    keys = jax.random.split(key, 2 + n_layers)
    emb = jax.random.normal(keys[0], (vocab, d_model), jnp.float32) * std

    def lin(kk, din, dout):
        w = jax.random.normal(kk, (din, dout), jnp.float32) * std   # stored as [in, out]
        return w, jnp.zeros((1, dout), jnp.float32)

    layers = []
    for i in range(n_layers):
        lk = jax.random.split(keys[2 + i], 6)
        wq, bq = lin(lk[0], d_model, d_model)
        wk, bk = lin(lk[1], d_model, d_model)
        wv, bv = lin(lk[2], d_model, d_model)
        wo, bo = lin(lk[3], d_model, d_model)
        w1, b1 = lin(lk[4], d_model, d_ff)
        w2, b2 = lin(lk[5], d_ff, d_model)
        layers.append(dict(
            wq=wq, bq=bq, wk=wk, bk=bk, wv=wv, bv=bv, wo=wo, bo=bo,
            w1=w1, b1=b1, w2=w2, b2=b2,
            g1=jnp.ones((1, d_model), jnp.float32), be1=jnp.zeros((1, d_model), jnp.float32),
            g2=jnp.ones((1, d_model), jnp.float32), be2=jnp.zeros((1, d_model), jnp.float32),
        ))

    head_w, head_b = lin(keys[1], d_model, vocab)
    lnf_g = jnp.ones((1, d_model), jnp.float32)
    lnf_b = jnp.zeros((1, d_model), jnp.float32)
    return dict(emb=emb, layers=layers, head_w=head_w, head_b=head_b,
                lnf_g=lnf_g, lnf_b=lnf_b)


def prepare_pallas_params(params):
    """Fuse QKV and cast all matmul weights to bf16 for the Pallas path."""
    out = dict(emb=params["emb"],
               lnf_g=params["lnf_g"], lnf_b=params["lnf_b"],
               head_w=params["head_w"].astype(jnp.bfloat16),
               head_b=params["head_b"],
               layers=[])
    for L in params["layers"]:
        out["layers"].append(dict(
            wqkv=jnp.concatenate([L["wq"], L["wk"], L["wv"]], axis=1).astype(jnp.bfloat16),
            bqkv=jnp.concatenate([L["bq"], L["bk"], L["bv"]], axis=1),
            wo=L["wo"].astype(jnp.bfloat16), bo=L["bo"],
            w1=L["w1"].astype(jnp.bfloat16), b1=L["b1"],
            w2=L["w2"].astype(jnp.bfloat16), b2=L["b2"],
            g1=L["g1"], be1=L["be1"], g2=L["g2"], be2=L["be2"],
        ))
    return out


def wikipedia_transformer_forward(pparams, input_ids, pe, d_model, n_heads):
    B, S = input_ids.shape
    D = d_model
    dk = D // n_heads

    # embedding lookup + scale + positional encoding (XLA glue)
    x = jnp.take(pparams["emb"], input_ids, axis=0) * math.sqrt(D)
    x = x + pe[None, :S, :]
    x2d = x.reshape(B * S, D).astype(jnp.float32)              # residual stream, f32
    x2d_bf16 = x2d.astype(jnp.bfloat16)                        # bf16 copy feeding QKV projection

    for L in pparams["layers"]:
        qkv2d = run_qkv_proj(x2d_bf16, L["wqkv"], L["bqkv"])   # (B*S, 3D) bf16
        ctx2d = run_attention(qkv2d, B, S, n_heads, dk)        # (B*S, D) bf16, no XLA transposes
        x2d, x2d_bf16 = run_post_attn_ffn(x2d, ctx2d, L)       # (B*S, D) f32 + bf16

    logits2d = run_ln_head(x2d, pparams["lnf_g"], pparams["lnf_b"],
                           pparams["head_w"], pparams["head_b"])
    return logits2d.reshape(B, S, -1)


# ----------------------------- pure-JAX reference (for validation) -----------------------------

def reference_forward(params, input_ids, pe, d_model, n_heads):
    B, S = input_ids.shape
    d_k = d_model // n_heads
    x = jnp.take(params["emb"], input_ids, axis=0) * math.sqrt(d_model)
    x = x + pe[None, :S, :]
    row = jnp.arange(S)[:, None]
    col = jnp.arange(S)[None, :]
    causal = col <= row

    def ln(v, g, b, eps=1e-5):
        m = jnp.mean(v, -1, keepdims=True)
        var = jnp.mean((v - m) ** 2, -1, keepdims=True)
        return (v - m) / jnp.sqrt(var + eps) * g + b

    for L in params["layers"]:
        q = x @ L["wq"] + L["bq"]
        k = x @ L["wk"] + L["bk"]
        v = x @ L["wv"] + L["bv"]
        q = q.reshape(B, S, n_heads, d_k).transpose(0, 2, 1, 3)
        k = k.reshape(B, S, n_heads, d_k).transpose(0, 2, 1, 3)
        v = v.reshape(B, S, n_heads, d_k).transpose(0, 2, 1, 3)
        s = jnp.einsum("bhqd,bhkd->bhqk", q, k) / math.sqrt(d_k)
        s = jnp.where(causal[None, None], s, -1e9)
        p = jax.nn.softmax(s, axis=-1)
        o = jnp.einsum("bhqk,bhkd->bhqd", p, v).transpose(0, 2, 1, 3).reshape(B, S, d_model)
        o = o @ L["wo"] + L["bo"]
        x = ln(x + o, L["g1"], L["be1"])
        h = x @ L["w1"] + L["b1"]
        h = 0.5 * h * (1.0 + jax.lax.erf(h / math.sqrt(2.0)))
        h = h @ L["w2"] + L["b2"]
        x = ln(x + h, L["g2"], L["be2"])
    x = ln(x, params["lnf_g"], params["lnf_b"])
    return x @ params["head_w"] + params["head_b"]


# ----------------------------- main -----------------------------

if __name__ == "__main__":
    # small config consistent with the module
    vocab_size, d_model, n_heads, d_ff, n_layers, max_length = 128, 32, 4, 64, 2, 16
    B, S = 2, 8

    key = jax.random.PRNGKey(0)
    pkey, ikey = jax.random.split(key)
    params = init_params(pkey, vocab_size, d_model, n_heads, d_ff, n_layers)
    pparams = prepare_pallas_params(params)
    pe = make_positional_encoding(max_length, d_model)

    input_ids = jax.random.randint(ikey, (B, S), 0, vocab_size, dtype=jnp.int32)

    logits = wikipedia_transformer_forward(pparams, input_ids, pe, d_model, n_heads)
    logits = jax.block_until_ready(logits)
    assert logits.shape == (B, S, vocab_size)

    ref = jax.block_until_ready(reference_forward(params, input_ids, pe, d_model, n_heads))
    if not jnp.allclose(logits, ref, atol=2e-2, rtol=2e-2):
        err = float(jnp.max(jnp.abs(logits - ref)))
        raise AssertionError(
            f"Pallas output does not match JAX reference (max abs err {err:.4e})")

    print("KERNEL_OK")
</pallas_src>

<mosaic_0001>
module attributes {stable_mosaic.version = 11 : i64} {
  func.func @k(%arg0: i32, %arg1: memref<8x128xf32, #tpu.memory_space<vmem>>, %arg2: memref<8x128xf32, #tpu.memory_space<vmem>>) attributes {dimension_semantics = [#tpu.dimension_semantics<arbitrary>], iteration_bounds = array<i64: 2>, scalar_prefetch = 0 : i64, scratch_operands = 0 : i64, tpu.core_type = #tpu.core_type<tc>, window_params = [{pipeline_mode = #tpu.pipeline_mode<synchronous>, transform_indices = @transform_0, window_bounds = array<i64: 8, 128>}, {transform_indices = @transform_1, window_bounds = array<i64: 8, 128>}]} {
    %c0 = arith.constant 0 : index
    %c0_0 = arith.constant 0 : index
    %0 = vector.load %arg1[%c0, %c0_0] : memref<8x128xf32, #tpu.memory_space<vmem>>, vector<8x128xf32>
    %cst = arith.constant 1.000000e+00 : f32
    %1 = vector.broadcast %cst : f32 to vector<8x128xf32>
    %2 = arith.addf %0, %1 : vector<8x128xf32>
    %c0_1 = arith.constant 0 : index
    %c0_2 = arith.constant 0 : index
    %3 = vector.load %arg2[%c0_1, %c0_2] : memref<8x128xf32, #tpu.memory_space<vmem>>, vector<8x128xf32>
    tpu.vector_store %arg2[%c0_1, %c0_2], %2 {strides = array<i32>} : memref<8x128xf32, #tpu.memory_space<vmem>>, vector<8x128xf32>,
    return
  }
  func.func @transform_0(%arg0: i32) -> (i32, i32) {
    %c0_i32 = arith.constant 0 : i32
    %c0_i32_0 = arith.constant 0 : i32
    %c0_i32_1 = arith.constant 0 : i32
    return %c0_i32, %c0_i32_0 : i32, i32
  }
  func.func @transform_1(%arg0: i32) -> (i32, i32) {
    %c0_i32 = arith.constant 0 : i32
    %c0_i32_0 = arith.constant 0 : i32
    return %arg0, %c0_i32 : i32, i32
  }
}

module attributes {stable_mosaic.version = 11 : i64} {
  func.func @qkv_proj_kernel(%arg0: i32, %arg1: memref<16x32xbf16, #tpu.memory_space<vmem>>, %arg2: memref<32x96xbf16, #tpu.memory_space<vmem>>, %arg3: memref<1x96xf32, #tpu.memory_space<vmem>>, %arg4: memref<16x96xbf16, #tpu.memory_space<vmem>>) attributes {dimension_semantics = [#tpu.dimension_semantics<parallel>], iteration_bounds = array<i64: 1>, scalar_prefetch = 0 : i64, scratch_operands = 0 : i64, tpu.core_type = #tpu.core_type<tc>, window_params = [{transform_indices = @transform_0, window_bounds = array<i64: 16, 32>}, {pipeline_mode = #tpu.pipeline_mode<synchronous>, transform_indices = @transform_1, window_bounds = array<i64: 32, 96>}, {pipeline_mode = #tpu.pipeline_mode<synchronous>, transform_indices = @transform_2, window_bounds = array<i64: 1, 96>}, {transform_indices = @transform_3, window_bounds = array<i64: 16, 96>}]} {
    %c0 = arith.constant 0 : index
    %c0_0 = arith.constant 0 : index
    %0 = vector.load %arg1[%c0, %c0_0] : memref<16x32xbf16, #tpu.memory_space<vmem>>, vector<16x32xbf16>
    %c0_1 = arith.constant 0 : index
    %c0_2 = arith.constant 0 : index
    %1 = vector.load %arg2[%c0_1, %c0_2] : memref<32x96xbf16, #tpu.memory_space<vmem>>, vector<32x96xbf16>
    %cst = arith.constant dense<0.000000e+00> : vector<16x96xf32>
    %2 = tpu.matmul %0, %1, %cst {dimension_numbers = #tpu.dot_dimension_numbers<[1], [0], [0], [1], [0, 0, 1, 1], [], []>} : vector<16x32xbf16>, vector<32x96xbf16>, vector<16x96xf32> -> vector<16x96xf32>
    %c0_3 = arith.constant 0 : index
    %c0_4 = arith.constant 0 : index
    %3 = vector.load %arg3[%c0_3, %c0_4] : memref<1x96xf32, #tpu.memory_space<vmem>>, vector<1x96xf32>
    %4 = vector.broadcast %3 : vector<1x96xf32> to vector<16x96xf32>
    %5 = arith.addf %2, %4 : vector<16x96xf32>
    %6 = arith.truncf %5 : vector<16x96xf32> to vector<16x96xbf16>
    %c0_5 = arith.constant 0 : index
    %c0_6 = arith.constant 0 : index
    %7 = vector.load %arg4[%c0_5, %c0_6] : memref<16x96xbf16, #tpu.memory_space<vmem>>, vector<16x96xbf16>
    tpu.vector_store %arg4[%c0_5, %c0_6], %6 {strides = array<i32>} : memref<16x96xbf16, #tpu.memory_space<vmem>>, vector<16x96xbf16>,
    return
  }
  func.func @transform_0(%arg0: i32) -> (i32, i32) {
    %c0_i32 = arith.constant 0 : i32
    %c0_i32_0 = arith.constant 0 : i32
    return %arg0, %c0_i32 : i32, i32
  }
  func.func @transform_1(%arg0: i32) -> (i32, i32) {
    %c0_i32 = arith.constant 0 : i32
    %c0_i32_0 = arith.constant 0 : i32
    %c0_i32_1 = arith.constant 0 : i32
    return %c0_i32, %c0_i32_0 : i32, i32
  }
  func.func @transform_2(%arg0: i32) -> (i32, i32) {
    %c0_i32 = arith.constant 0 : i32
    %c0_i32_0 = arith.constant 0 : i32
    %c0_i32_1 = arith.constant 0 : i32
    return %c0_i32, %c0_i32_0 : i32, i32
  }
  func.func @transform_3(%arg0: i32) -> (i32, i32) {
    %c0_i32 = arith.constant 0 : i32
    %c0_i32_0 = arith.constant 0 : i32
    return %arg0, %c0_i32 : i32, i32
  }
}

</mosaic_0001>

<bundles_post_ra>
// kernel: tpu_custom_call.1
= control target key start
LH: loop header
LB: loop body
LE: loop exit
PB: predicated region body
PF: predicated region fallthrough
CT: control target
= control target key end

     0   :  { %6 = vsyncpa [#allocation3], 0  ;;  %s482_s0 = inlined_call_operand.hbm [shape: f32[8,128], index: 0, kind: input, shape index: {}]   ;;  %s483_s1 = inlined_call_operand.hbm [shape: f32[16,128], index: 1, kind: output, shape index: {}]  }
   0x1   :  { %7 = vsyncpa [#allocation4], 0 }
   0x2   :  { %9 = vsyncpa [#allocation4 + $0x1], 0  ;;  %s352_s6 = smov 0   ;;  %s354_s7 = smov 0  }
   0x3   :  { %s356_s8 = smov 0   ;;  %s358_s9 = smov 0  }
   0x4 LB: > { %s373_s10 = sadd.s32 4294967295, %s338_s9   ;;  %s184_s11 = sadd.s32 4294967294, %s338_s9   ;;  %s338_s9 = sphi %s358_s9, %s499_s9   ;;  %s334_s8 = sphi %s356_s8, %s498_s8   ;;  %s330_s7 = sphi %s354_s7, %s497_s7   ;;  %s326_s6 = sphi %s352_s6, %s496_s6  }
   0x5   : > { %s377_s12 = sadd.s32 1, %s338_s9   ;;  %s43_s13 = sadd.s32 1, %s334_s8 }
   0x6   : > { %s40_s14 = ssub.s32 %s338_s9, %s377_s12  ;;  %p53_p0 = scmp.ne.s32.totalorder %s334_s8, %s330_s7 }
   0x7   : > { %p41_p1 = scmp.eq.s32.totalorder %s40_s14, 0  ;;  %p54_p2 = scmp.eq.s32.totalorder %s373_s10, 1 }
   0x8   : > { %p59_p3 = scmp.ne.s32.totalorder %s330_s7, %s326_s6  ;;  %p60_p4 = scmp.eq.s32.totalorder %s184_s11, 1 }
   0x9   : > { %s388_s15 = scalar_select %p41_p1, %s334_s8, %s43_s13  }
   0xa   : > { %p390_p5 = por %p54_p2, %p53_p0  ;;  %p394_p6 = por %p60_p4, %p59_p3 }
   0xb   : > { %p185_p7 = scmp.ge.s32.totalorder %s338_s9, 1  ;;  %p67_p8 = scmp.lt.s32.totalorder %s338_s9, 3 }
   0xc   : > { %s487_s16 = scalar_select %p390_p5, 1, 0 }
   0xd   : > { %s488_s17 = scalar_select %p394_p6, 1, 0 }
   0xe   : > { %p484_p9 = scmp.eq.s32.totalorder %s373_s10, 0  ;;  %p401_p10 = pnand %p185_p7, %p67_p8 }
   0xf   : > { %s340_s19 = smov [#allocation2]   ;;  %s244_s24 = scalar_lea.hbm %s482_s0, 128 }
  0x10   : > { %s489_s18 = scalar_select %p401_p10, 1, 0 }
  0x11   : > { %s80_s20 = sshll.u32 %s340_s19, 4  ;;  %p200_p11 = pneg %p401_p10  ;;  %s81_s20 = int_to_ptr.vmem [resolvable:$true] %s80_s20 }
  0x12   : > { %p245_p13 = scmp.ne.s32.totalorder %s482_s0, %s244_s24  ;;  %p251_p3 = scmp.lt.u32.totalorder %s244_s24, %s482_s0 }
  0x13   : > { %p409_p12 = pnand %p484_p9, %p200_p11 }
  0x15   : > { %p246_p0 = pneg %p409_p12 }
  0x17   : > { %p247_p1 = pnand %p246_p0, %p245_p13 }
  0x19   : > { %p248_p2 = pneg %p247_p1 }
  0x1b   : > { %p253_p4 = pnand %p251_p3, %p248_p2 }
  0x1d   : > { %256 = shalt.err (!%p253_p4)
}
  0x1e   : > { %s257_s29 = scalar_lea.vmem %s81_s20, 128  ;;  %p265_p9 = scmp.lt.s32.totalorder %s81_s20, %s81_s20 }
  0x1f   : > { %p258_p7 = scmp.ne.s32.totalorder %s81_s20, %s257_s29  ;;  %p266_p6 = scmp.lt.s32.totalorder %s257_s29, %s257_s29 }
  0x21   : > { %p260_p8 = pnand %p258_p7, %p246_p0  ;;  %p267_p5 = por %p266_p6, %p265_p9 }
  0x23   : > { %p261_p11 = pneg %p260_p8 }
  0x25   : > { %p268_p10 = pnand %p267_p5, %p261_p11 }
  0x27   : > { %271 = shalt.err (!%p268_p10)
}
  0x28   : > { %203 = dma.hbm_to_vmem [thread:$0]  (!%p409_p12), %s482_s0, 128, %s81_s20, [#allocation3]  }
  0x29   : > { %p491_p13 = scmp.ne.s32.totalorder %s489_s18, 0 }
  0x2a   : > { %p492_p1 = scmp.eq.s32.totalorder (!%p491_p13), %s373_s10, 0 }
  0x2b   : > { %93 = sbr.rel (%p491_p13) target bundleno = 77 (0x4d), region = 24 }
  0x32   : > { %317 = dma.done.wait (%p492_p1), [#allocation3], 128   ;;  %p493_p0 = pmov %p492_p1 }
  0x33   : > { %s105_s3 = sand.u32 1, %s330_s7   ;;  %s191_s13 = sshll.u32 %s373_s10, 7  ;;  %v108_v0 = vld [vmem:[#allocation2] sm:$0xff] }
  0x34   : > { %319 = vsyncadd (%p493_p0), [#allocation3], 4294967168  ;;  %s189_s4 = sshll.u32 %s105_s3, 3  ;;  %v109_v1 = vadd.f32 1.0, %v108_v0  ;;  %s442_s19 = scalar_lea.hbm %s483_s1, %s191_s13 }
  0x35   : > { %s107_s5 = scalar_lea.vmem [#allocation5], %s189_s4  ;;  %s112_s20 = scalar_lea.sflag [#allocation4], %s105_s3 }
  0x36   : > { %s125_s11 = sshll.u32 %s107_s5, 4  ;;  %110 = vst [vmem:[%s107_s5] sm:$0xff] %v109_v1  ;;  %p494_p6 = scmp.ne.s32.totalorder %s487_s16, 0  ;;  %s437_s11 = int_to_ptr.vmem [resolvable:$true] %s125_s11 }
  0x37   : > { %s272_s21 = scalar_lea.vmem %s437_s11, 128  ;;  %s341_s10 = smov [#allocation5]  }
  0x38   : > { %p273_p5 = scmp.ne.s32.totalorder %s437_s11, %s272_s21  ;;  %s276_s22 = sshll.u32 %s341_s10, 4  ;;  %s277_s22 = int_to_ptr.vmem [resolvable:$false] %s276_s22 }
  0x39   : > { %s278_s23 = scalar_lea.vmem %s277_s22, 256  ;;  %p279_p12 = scmp.lt.s32.totalorder %s437_s11, %s277_s22 }
  0x3a   : > { %p274_p9 = pnand %p273_p5, %p494_p6  ;;  %p280_p2 = scmp.lt.s32.totalorder %s278_s23, %s272_s21 }
  0x3c   : > { %p275_p10 = pneg %p274_p9  ;;  %p281_p3 = por %p280_p2, %p279_p12 }
  0x3e   : > { %p282_p4 = pnand %p281_p3, %p275_p10 }
  0x40   : > { %285 = shalt.err (!%p282_p4)
}
  0x41   : > { %s286_s24 = scalar_lea.hbm %s442_s19, 128  ;;  %s290_s27 = scalar_lea.hbm %s483_s1, 256 }
  0x42   : > { %p287_p7 = scmp.ne.s32.totalorder %s442_s19, %s286_s24  ;;  %p291_p13 = scmp.lt.u32.totalorder %s442_s19, %s483_s1 }
  0x43   : > { %p292_p1 = scmp.lt.u32.totalorder %s290_s27, %s286_s24  ;;  %p294_p5 = scmp.lt.u32.totalorder %s286_s24, %s442_s19 }
  0x44   : > { %p288_p8 = pnand %p287_p7, %p494_p6 }
  0x45   : > { %p293_p0 = por %p292_p1, %p291_p13 }
  0x46   : > { %p289_p11 = pneg %p288_p8 }
  0x47   : > { %p295_p9 = por %p294_p5, %p293_p0 }
  0x49   : > { %p296_p10 = pnand %p295_p9, %p289_p11 }
  0x4b   : > { %299 = shalt.err (!%p296_p10)
}
  0x4c   : > { %198 = dma.vmem_to_hbm [thread:$0]  (%p494_p6), %s437_s11, 128, %s442_s19, %s112_s20  }
  0x4d PF: > { %p210_p12 = scmp.ge.s32.totalorder %s338_s9, 2  ;;  %s137_s30 = sand.u32 1, %s326_s6  }
  0x4e   : > { %p495_p2 = scmp.ne.s32.totalorder %s488_s17, 0  ;;  %s138_s2 = scalar_lea.sflag [#allocation4], %s137_s30 }
  0x50   : > { %p205_p3 = pnand %p210_p12, %p495_p2 }
  0x52   : > { %321 = dma.done.wait (!%p205_p3), %s138_s2, 128  }
  0x53   : > { %323 = vsyncadd (!%p205_p3), %s138_s2, 4294967168  ;;  %p12_p4 = scmp.ge.s32.totalorder %s377_s12, 4   ;;  %s496_s6 = smov %s330_s7 }
  0x54   : > { %s497_s7 = smov %s334_s8  ;;  %s498_s8 = smov %s388_s15 }
  0x55   : > { %s499_s9 = smov %s377_s12  ;;  %14 = sbr.rel (!%p12_p4) target bundleno = 4 (0x4), region = 61 }
  0x5c   :  { %143 = vsyncpa [#allocation3], 1 }
  0x5d   :  { %145 = vsyncpa [#allocation3 + $0x1], 1 }
  0x5e   :  { %146 = vsyncpa [#allocation4], 1 }
  0x5f   :  { %148 = vsyncpa [#allocation4 + $0x1], 1 }

// kernel: tpu_custom_call.1
= control target key start
LH: loop header
LB: loop body
LE: loop exit
PB: predicated region body
PF: predicated region fallthrough
CT: control target
= control target key end

     0   :  { %8 = vsyncpa [#allocation3], 0  ;;  %s325_s0 = inlined_call_operand.hbm [shape: bf16[16,32], index: 0, kind: input, shape index: {}]   ;;  %s326_s1 = inlined_call_operand.hbm [shape: bf16[32,96], index: 1, kind: input, shape index: {}]   ;;  %s327_s2 = inlined_call_operand.vmem [shape: f32[1,96], index: 2, kind: input, shape index: {}]   ;;  %s328_s3 = inlined_call_operand.hbm [shape: bf16[16,96], index: 3, kind: output, shape index: {}]  }
   0x1   :  { %9 = vsyncpa [#allocation6], 0 }
   0x2   :  { %10 = vsyncpa [#allocation4], 0  ;;  %s250_s12 = smov [#allocation2]   ;;  %s178_s16 = scalar_lea.hbm %s325_s0, 128 }
   0x3   :  { %s16_s13 = sshll.u32 %s250_s12, 4  ;;  %p179_p0 = scmp.ne.s32.totalorder %s325_s0, %s178_s16  ;;  %s17_s13 = int_to_ptr.vmem [resolvable:$true] %s16_s13 }
   0x4   :  { %p182_p1 = scmp.lt.u32.totalorder %s178_s16, %s325_s0 }
   0x6   :  { %p184_p2 = pnand %p182_p1, %p179_p0 }
   0x8   :  { %187 = shalt.err (!%p184_p2)
}
   0x9   :  { %s188_s21 = scalar_lea.vmem %s17_s13, 128  ;;  %p193_p4 = scmp.lt.s32.totalorder %s17_s13, %s17_s13 }
   0xa   :  { %p189_p3 = scmp.ne.s32.totalorder %s17_s13, %s188_s21  ;;  %p194_p5 = scmp.lt.s32.totalorder %s188_s21, %s188_s21 }
   0xc   :  { %p195_p6 = por %p194_p5, %p193_p4 }
   0xe   :  { %p196_p7 = pnand %p195_p6, %p189_p3 }
  0x10   :  { %199 = shalt.err (!%p196_p7)
}
  0x11   :  { %s251_s22 = smov 64   ;;  %s252_s23 = smov 4  }
  0x12   :  { %22 = dma.hbm_to_vmem [thread:$0]  %s325_s0, 128, %s17_s13, [#allocation3], %s251_s22, %s251_s22, %s252_s23  }
  0x13   :  { %s253_s26 = smov [#allocation5]   ;;  %s200_s30 = scalar_lea.hbm %s326_s1, 256 }
  0x14   :  { %s28_s27 = sshll.u32 %s253_s26, 4  ;;  %p201_p8 = scmp.ne.s32.totalorder %s326_s1, %s200_s30  ;;  %s29_s27 = int_to_ptr.vmem [resolvable:$true] %s28_s27 }
  0x15   :  { %p204_p9 = scmp.lt.u32.totalorder %s200_s30, %s326_s1 }
  0x17   :  { %p206_p10 = pnand %p204_p9, %p201_p8 }
  0x19   :  { %209 = shalt.err (!%p206_p10)
}
  0x1a   :  { %s210_s8 = scalar_lea.vmem %s29_s27, 256  ;;  %p215_p12 = scmp.lt.s32.totalorder %s29_s27, %s29_s27 }
  0x1b   :  { %p211_p11 = scmp.ne.s32.totalorder %s29_s27, %s210_s8  ;;  %p216_p13 = scmp.lt.s32.totalorder %s210_s8, %s210_s8 }
  0x1d   :  { %p217_p0 = por %p216_p13, %p215_p12 }
  0x1f   :  { %p218_p1 = pnand %p217_p0, %p211_p11 }
  0x21   :  { %221 = shalt.err (!%p218_p1)
}
  0x22   :  { %34 = dma.hbm_to_vmem [thread:$0]  %s326_s1, 256, %s29_s27, [#allocation6], %s251_s22, %s251_s22, %s252_s23  }
  0x23   :  { %244 = dma.done.wait [#allocation3], 128  }
  0x24   :  { %245 = vsyncadd [#allocation3], 4294967168 }
  0x25   :  { %246 = dma.done.wait [#allocation6], 256  }
  0x26   :  { %247 = vsyncadd [#allocation6], 4294967040  ;;  %v254_v0 = vmov 0.0   ;;  %vm255_vm0 = vmmov 0   ;;  %v175_v1 = vld [vmem:[#allocation5] sm:$0xff]   ;;  %v176_v2 = vld [vmem:[#allocation5 + $0x8] sm:$0xff]  }
  0x27   :  { %160 = vmatprep.subr.bf16.mxu0 %v254_v0  ;;  %164 = vmatprep.mubr.msk.bf16.mxu0 %vm255_vm0, %v254_v0  ;;  %v177_v3 = vld [vmem:[#allocation2] sm:$0xff]   ;;  %vm74_vm1 = vcmask 261120   ;;  %vm127_vm2 = vcmask 781312   ;;  %s256_s1 = smov [#allocation7]  }
  0x28   :  { %161 = vmatpush3.bf16.msra.mxu0 %v175_v1  ;;  %v148_v4 = vld [vmem:[%s327_s2] ss:$0 sm:$0xff]  ;;  %s135_s12 = sshll.u32 %s256_s1, 4  ;;  %s136_s12 = int_to_ptr.vmem [resolvable:$true] %s135_s12 }
  0x29   :  { %162 = vmatprep.subr.bf16.mxu0 %v254_v0  ;;  %s222_s13 = scalar_lea.vmem %s136_s12, 128  ;;  %p227_p3 = scmp.lt.s32.totalorder %s136_s12, %s136_s12 }
  0x2a   :  { %p223_p2 = scmp.ne.s32.totalorder %s136_s12, %s222_s13  ;;  %p228_p4 = scmp.lt.s32.totalorder %s222_s13, %s222_s13 }
  0x2c   :  { %163 = vmatpush3.bf16.msra.mxu0 %v176_v2  ;;  %p229_p5 = por %p228_p4, %p227_p3 }
  0x2e   :  { %p230_p6 = pnand %p229_p5, %p223_p2 }
  0x2f   :  { %165 = vmatmul.mubr.msk.bf16.vlgmr.msra.gmra.mrb[0].mxu0 %vm74_vm1, %v177_v3 }
 0x102   :  { %v112_v5 = vpop.f32.mrb[0].mxu0 }
 0x103   :  { %v113_v6 = vadd.f32 %v148_v4, %v112_v5  ;;  %v166_v7 = vpop.f32.mrb[1].mxu0 }
 0x104   :  { %v115_v8 = vpop.f32.mrb[2].mxu0 }
 0x105   :  { %v155_v9 = vpack.c.bf16 %v113_v6, %v113_v6  ;;  %v116_v10 = vadd.f32 %v148_v4, %v115_v8  ;;  %v167_v11 = vpop.f32.mrb[3].mxu0 }
 0x107   :  { %v156_v12 = vpack.c.bf16 %v116_v10, %v116_v10  ;;  %128 = vst.msk [vmem:[#allocation7] sm:$0xf] %vm127_vm2, %v155_v9 }
 0x109   :  { %129 = vst.msk [vmem:[#allocation7 + $0x4] sm:$0xf] %vm127_vm2, %v156_v12 }
 0x10a   :  { %233 = shalt.err (!%p230_p6)
}
 0x10b   :  { %s234_s15 = scalar_lea.hbm %s328_s3, 128 }
 0x10c   :  { %p235_p7 = scmp.ne.s32.totalorder %s328_s3, %s234_s15  ;;  %p238_p8 = scmp.lt.u32.totalorder %s234_s15, %s328_s3 }
 0x10e   :  { %p240_p9 = pnand %p238_p8, %p235_p7 }
 0x110   :  { %243 = shalt.err (!%p240_p9)
}
 0x111   :  { %141 = dma.vmem_to_hbm [thread:$0]  %s136_s12, 128, %s328_s3, [#allocation4], %s251_s22, %s251_s22, %s252_s23  }
 0x112   :  { %248 = dma.done.wait [#allocation4], 128  }
 0x113   :  { %249 = vsyncadd [#allocation4], 4294967168 }
 0x114   :  { %145 = vsyncpa [#allocation3], 1 }
 0x115   :  { %146 = vsyncpa [#allocation6], 1 }
 0x116   :  { %147 = vsyncpa [#allocation4], 1 }

</bundles_post_ra>
